<compile_context>
chip_gen: v7x
topology: tpu7x:2x2x1
jax: 0.10.0
libtpu: 0.0.40
codegen_flags: <defaults>
</compile_context>

<pallas_src>
import functools

import jax
import jax.numpy as jnp
import numpy as np
from jax.experimental import pallas as pl
from jax.experimental.pallas import tpu as pltpu


def residual_block_kernel(x_ref, w1_ref, w2_ref, bn_ref, out_ref, mid_ref):
    # x_ref  : (nb, H+2, W*Cin) f32   H-padded, lane-dense input block
    # w1_ref : (3, W*Cin, W*Cout) bf16  banded conv1 weights (per kh)
    # w2_ref : (3, W*Cout, W*Cout) bf16 banded conv2 weights (per kh)
    # bn_ref : (4, W*Cout) f32        rows = [scale1, shift1, scale2, shift2]
    # out_ref: (nb, H, W*Cout) f32
    # mid_ref: (nb, H+2, W*Cout) bf16 scratch, H-padded conv1 activation
    nb, hp2, wcin = x_ref.shape
    H = hp2 - 2
    WC = out_ref.shape[2]

    def dot(a, b):
        return jnp.dot(a, b, preferred_element_type=jnp.float32)

    s1 = bn_ref[0:1, :]
    t1 = bn_ref[1:2, :]
    s2 = bn_ref[2:3, :]
    t2 = bn_ref[3:4, :]

    # ---- conv1: kw taps + W zero-padding folded into banded weights ------------
    x_mid = x_ref[:, 1:1 + H, :]                         # f32; reused as residual
    acc = dot(x_ref[:, 0:H, :].astype(jnp.bfloat16).reshape(nb * H, wcin), w1_ref[0])
    acc += dot(x_mid.astype(jnp.bfloat16).reshape(nb * H, wcin), w1_ref[1])
    acc += dot(x_ref[:, 2:2 + H, :].astype(jnp.bfloat16).reshape(nb * H, wcin),
               w1_ref[2])

    # BN1 (folded, f32) + ReLU
    act = jnp.maximum(acc * s1 + t1, 0.0)                # (nb*H, WC) f32
    act_bf16 = act.astype(jnp.bfloat16)

    # H-padded bf16 scratch for the +/-1 row-shifted taps of conv2.
    # Borders are zeroed EVERY step (scratch persists across grid iterations, but
    # with "parallel" sharding a core may never execute step 0 -> no pid gating).
    mid_ref[:, 0:1, :] = jnp.zeros((nb, 1, WC), mid_ref.dtype)
    mid_ref[:, H + 1:H + 2, :] = jnp.zeros((nb, 1, WC), mid_ref.dtype)
    mid_ref[:, 1:1 + H, :] = act_bf16.reshape(nb, H, WC)

    # ---- conv2: same banded trick; center tap comes straight from registers ----
    acc2 = dot(mid_ref[:, 0:H, :].reshape(nb * H, WC), w2_ref[0])
    acc2 += dot(act_bf16, w2_ref[1])
    acc2 += dot(mid_ref[:, 2:2 + H, :].reshape(nb * H, WC), w2_ref[2])

    out = acc2 * s2 + t2
    # identity residual (stride=1 / downsample=None / Cin==Cout) + ReLU
    out = jnp.maximum(out + x_mid.reshape(nb * H, WC), 0.0)
    out_ref[...] = out.reshape(nb, H, WC).astype(out_ref.dtype)


def _banded_weight(w_oihw, W):
    """OIHW 3x3 conv weight -> (3, W*Cin, W*Cout) banded bf16 matrices (per kh).

    B[kh, wi*Cin+ci, w*Cout+co] = w[co, ci, kh, kw] with wi = w + kw - 1; taps that
    fall outside [0, W) (the W zero-padding) are dropped from the band.
    """
    cout, cin = w_oihw.shape[0], w_oihw.shape[1]
    w_t = jnp.transpose(w_oihw, (2, 3, 1, 0))                  # (kh, kw, ci, co)
    sel = np.zeros((3, W, W), np.float32)
    for kw in range(3):
        for w in range(W):
            wi = w + kw - 1
            if 0 <= wi < W:
                sel[kw, wi, w] = 1.0
    band = jnp.einsum("kab,hkcd->hacbd", jnp.asarray(sel), w_t)
    return band.reshape(3, W * cin, W * cout).astype(jnp.bfloat16)


@functools.partial(jax.jit, static_argnames=("eps",))
def residual_block_2sl(x_nchw, w1_oihw, w2_oihw, bn1, bn2, eps=1e-5):
    """Forward pass of ResidualBlock_2sl (stride=1, dilation=1, no downsample).

    x_nchw : (N, C, H, W) float32
    w*_oihw: (C, C, 3, 3) float32 (PyTorch conv weight layout)
    bn*    : tuple (gamma, beta, running_mean, running_var), each (C,)
    returns (N, C, H, W) float32
    """
    N, Cin, H, W = x_nchw.shape
    Cout = w1_oihw.shape[0]
    assert Cin == Cout, "identity residual requires in_channels == out_channels"
    WC = W * Cout

    def fold_bn(bn):
        gamma, beta, mean, var = bn
        scale = gamma / jnp.sqrt(var + eps)
        shift = beta - mean * scale
        # tile per-channel params across W for the lane-dense (W*C) layout
        return (jnp.tile(scale, W).astype(jnp.float32),
                jnp.tile(shift, W).astype(jnp.float32))

    s1, t1 = fold_bn(bn1)
    s2, t2 = fold_bn(bn2)
    bn_params = jnp.stack([s1, t1, s2, t2], axis=0)            # (4, WC) f32

    w1 = _banded_weight(w1_oihw, W)        # (3, W*Cin,  W*Cout) bf16
    w2 = _banded_weight(w2_oihw, W)        # (3, W*Cout, W*Cout) bf16

    # NCHW -> lane-dense (N, H, W*C); pad H by 1 (W padding lives in the weights)
    x_dense = jnp.transpose(x_nchw, (0, 2, 3, 1)).reshape(N, H, W * Cin)
    x_pad = jnp.pad(x_dense, ((0, 0), (1, 1), (0, 0)))

    # batch blocking: flatten small batches into one step (M = nb*H matmul rows);
    # tile larger batches so the grid can be sharded across cores.
    if N <= 8:
        nb = N
    else:
        nb = 8 if N % 8 == 0 else (4 if N % 4 == 0 else (2 if N % 2 == 0 else 1))
    grid = (N // nb,)

    grid_spec = pltpu.PrefetchScalarGridSpec(
        num_scalar_prefetch=0,
        grid=grid,
        in_specs=[
            pl.BlockSpec((nb, H + 2, W * Cin), lambda n: (n, 0, 0)),
            pl.BlockSpec((3, W * Cin, WC), lambda n: (0, 0, 0)),
            pl.BlockSpec((3, WC, WC), lambda n: (0, 0, 0)),
            pl.BlockSpec((4, WC), lambda n: (0, 0)),
        ],
        out_specs=pl.BlockSpec((nb, H, WC), lambda n: (n, 0, 0)),
        scratch_shapes=[pltpu.VMEM((nb, H + 2, WC), jnp.bfloat16)],
    )

    out_dense = pl.pallas_call(
        residual_block_kernel,
        out_shape=jax.ShapeDtypeStruct((N, H, WC), x_nchw.dtype),
        grid_spec=grid_spec,
        compiler_params=pltpu.CompilerParams(
            dimension_semantics=("parallel",),
            vmem_limit_bytes=48 * 1024 * 1024),
    )(x_pad, w1, w2, bn_params)

    out_nhwc = out_dense.reshape(N, H, W, Cout)
    return jnp.transpose(out_nhwc, (0, 3, 1, 2))       # back to NCHW


def residual_block_2sl_reference(x, w1, w2, bn1, bn2, eps=1e-5):
    """Plain-JAX (XLA) reference for correctness checking, NCHW layout."""
    def bn(o, p):
        gamma, beta, mean, var = p
        scale = gamma / jnp.sqrt(var + eps)
        shift = beta - mean * scale
        return o * scale[None, :, None, None] + shift[None, :, None, None]

    dn = ("NCHW", "OIHW", "NCHW")
    out = jax.lax.conv_general_dilated(x, w1, (1, 1), "SAME", dimension_numbers=dn)
    out = jnp.maximum(bn(out, bn1), 0.0)
    out = jax.lax.conv_general_dilated(out, w2, (1, 1), "SAME", dimension_numbers=dn)
    out = bn(out, bn2)
    return jnp.maximum(out + x, 0.0)


if __name__ == "__main__":
    key = jax.random.PRNGKey(0)
    ks = jax.random.split(key, 11)

    N, C, H, W = 2, 8, 16, 16          # W*C = 128 -> exactly one lane width

    def bf16_round(a):                  # keep inputs/weights bf16-representable so
        return a.astype(jnp.bfloat16).astype(jnp.float32)   # the bf16 MXU path stays close to the f32 ref

    x = bf16_round(jax.random.normal(ks[0], (N, C, H, W), jnp.float32))
    w1 = bf16_round(jax.random.normal(ks[1], (C, C, 3, 3), jnp.float32) * 0.1)
    w2 = bf16_round(jax.random.normal(ks[2], (C, C, 3, 3), jnp.float32) * 0.1)

    bn1 = (jax.random.uniform(ks[3], (C,), minval=0.5, maxval=1.5),
           jax.random.normal(ks[4], (C,)) * 0.1,
           jax.random.normal(ks[5], (C,)) * 0.1,
           jax.random.uniform(ks[6], (C,), minval=0.5, maxval=1.5))
    bn2 = (jax.random.uniform(ks[7], (C,), minval=0.5, maxval=1.5),
           jax.random.normal(ks[8], (C,)) * 0.1,
           jax.random.normal(ks[9], (C,)) * 0.1,
           jax.random.uniform(ks[10], (C,), minval=0.5, maxval=1.5))

    out = residual_block_2sl(x, w1, w2, bn1, bn2)
    out = jax.block_until_ready(out)

    ref = residual_block_2sl_reference(x, w1, w2, bn1, bn2)
    # only remaining numeric delta is the bf16 MXU path / bf16 mid-activation
    np.testing.assert_allclose(np.asarray(out), np.asarray(ref), rtol=1e-2, atol=1e-2)
    print("KERNEL_OK")
</pallas_src>

<mosaic_0001>
module attributes {stable_mosaic.version = 11 : i64} {
  func.func @residual_block_kernel(%arg0: i32, %arg1: memref<2x18x128xf32, #tpu.memory_space<vmem>>, %arg2: memref<3x128x128xbf16, #tpu.memory_space<vmem>>, %arg3: memref<3x128x128xbf16, #tpu.memory_space<vmem>>, %arg4: memref<4x128xf32, #tpu.memory_space<vmem>>, %arg5: memref<2x16x128xf32, #tpu.memory_space<vmem>>, %arg6: memref<2x18x128xbf16, #tpu.memory_space<vmem>>) attributes {dimension_semantics = [#tpu.dimension_semantics<parallel>], iteration_bounds = array<i64: 1>, scalar_prefetch = 0 : i64, scratch_operands = 1 : i64, tpu.core_type = #tpu.core_type<tc>, window_params = [{transform_indices = @transform_0, window_bounds = array<i64: 2, 18, 128>}, {pipeline_mode = #tpu.pipeline_mode<synchronous>, transform_indices = @transform_1, window_bounds = array<i64: 3, 128, 128>}, {pipeline_mode = #tpu.pipeline_mode<synchronous>, transform_indices = @transform_2, window_bounds = array<i64: 3, 128, 128>}, {pipeline_mode = #tpu.pipeline_mode<synchronous>, transform_indices = @transform_3, window_bounds = array<i64: 4, 128>}, {transform_indices = @transform_4, window_bounds = array<i64: 2, 16, 128>}]} {
    %c0 = arith.constant 0 : index
    %c0_0 = arith.constant 0 : index
    %0 = vector.load %arg4[%c0, %c0_0] : memref<4x128xf32, #tpu.memory_space<vmem>>, vector<1x128xf32>
    %c1 = arith.constant 1 : index
    %c0_1 = arith.constant 0 : index
    %1 = vector.load %arg4[%c1, %c0_1] : memref<4x128xf32, #tpu.memory_space<vmem>>, vector<1x128xf32>
    %c2 = arith.constant 2 : index
    %c0_2 = arith.constant 0 : index
    %2 = vector.load %arg4[%c2, %c0_2] : memref<4x128xf32, #tpu.memory_space<vmem>>, vector<1x128xf32>
    %c3 = arith.constant 3 : index
    %c0_3 = arith.constant 0 : index
    %3 = vector.load %arg4[%c3, %c0_3] : memref<4x128xf32, #tpu.memory_space<vmem>>, vector<1x128xf32>
    %c0_4 = arith.constant 0 : index
    %c1_5 = arith.constant 1 : index
    %c0_6 = arith.constant 0 : index
    %4 = vector.load %arg1[%c0_4, %c1_5, %c0_6] : memref<2x18x128xf32, #tpu.memory_space<vmem>>, vector<2x16x128xf32>
    %c0_7 = arith.constant 0 : index
    %c0_8 = arith.constant 0 : index
    %c0_9 = arith.constant 0 : index
    %5 = vector.load %arg1[%c0_7, %c0_8, %c0_9] : memref<2x18x128xf32, #tpu.memory_space<vmem>>, vector<2x16x128xf32>
    %6 = arith.truncf %5 : vector<2x16x128xf32> to vector<2x16x128xbf16>
    %7 = vector.shape_cast %6 : vector<2x16x128xbf16> to vector<32x128xbf16>
    %c0_10 = arith.constant 0 : index
    %c0_11 = arith.constant 0 : index
    %c0_12 = arith.constant 0 : index
    %8 = vector.load %arg2[%c0_10, %c0_11, %c0_12] : memref<3x128x128xbf16, #tpu.memory_space<vmem>>, vector<1x128x128xbf16>
    %9 = vector.shape_cast %8 : vector<1x128x128xbf16> to vector<128x128xbf16>
    %cst = arith.constant dense<0.000000e+00> : vector<32x128xf32>
    %10 = tpu.matmul %7, %9, %cst {dimension_numbers = #tpu.dot_dimension_numbers<[1], [0], [0], [1], [0, 0, 1, 1], [], []>} : vector<32x128xbf16>, vector<128x128xbf16>, vector<32x128xf32> -> vector<32x128xf32>
    %11 = arith.truncf %4 : vector<2x16x128xf32> to vector<2x16x128xbf16>
    %12 = vector.shape_cast %11 : vector<2x16x128xbf16> to vector<32x128xbf16>
    %c1_13 = arith.constant 1 : index
    %c0_14 = arith.constant 0 : index
    %c0_15 = arith.constant 0 : index
    %13 = vector.load %arg2[%c1_13, %c0_14, %c0_15] : memref<3x128x128xbf16, #tpu.memory_space<vmem>>, vector<1x128x128xbf16>
    %14 = vector.shape_cast %13 : vector<1x128x128xbf16> to vector<128x128xbf16>
    %cst_16 = arith.constant dense<0.000000e+00> : vector<32x128xf32>
    %15 = tpu.matmul %12, %14, %cst_16 {dimension_numbers = #tpu.dot_dimension_numbers<[1], [0], [0], [1], [0, 0, 1, 1], [], []>} : vector<32x128xbf16>, vector<128x128xbf16>, vector<32x128xf32> -> vector<32x128xf32>
    %16 = arith.addf %10, %15 : vector<32x128xf32>
    %c0_17 = arith.constant 0 : index
    %c2_18 = arith.constant 2 : index
    %c0_19 = arith.constant 0 : index
    %17 = vector.load %arg1[%c0_17, %c2_18, %c0_19] : memref<2x18x128xf32, #tpu.memory_space<vmem>>, vector<2x16x128xf32>
    %18 = arith.truncf %17 : vector<2x16x128xf32> to vector<2x16x128xbf16>
    %19 = vector.shape_cast %18 : vector<2x16x128xbf16> to vector<32x128xbf16>
    %c2_20 = arith.constant 2 : index
    %c0_21 = arith.constant 0 : index
    %c0_22 = arith.constant 0 : index
    %20 = vector.load %arg2[%c2_20, %c0_21, %c0_22] : memref<3x128x128xbf16, #tpu.memory_space<vmem>>, vector<1x128x128xbf16>
    %21 = vector.shape_cast %20 : vector<1x128x128xbf16> to vector<128x128xbf16>
    %cst_23 = arith.constant dense<0.000000e+00> : vector<32x128xf32>
    %22 = tpu.matmul %19, %21, %cst_23 {dimension_numbers = #tpu.dot_dimension_numbers<[1], [0], [0], [1], [0, 0, 1, 1], [], []>} : vector<32x128xbf16>, vector<128x128xbf16>, vector<32x128xf32> -> vector<32x128xf32>
    %23 = arith.addf %16, %22 : vector<32x128xf32>
    %24 = vector.broadcast %0 : vector<1x128xf32> to vector<32x128xf32>
    %25 = arith.mulf %23, %24 : vector<32x128xf32>
    %26 = vector.broadcast %1 : vector<1x128xf32> to vector<32x128xf32>
    %27 = arith.addf %25, %26 : vector<32x128xf32>
    %cst_24 = arith.constant 0.000000e+00 : f32
    %28 = vector.broadcast %cst_24 : f32 to vector<32x128xf32>
    %29 = arith.maximumf %27, %28 : vector<32x128xf32>
    %30 = arith.truncf %29 : vector<32x128xf32> to vector<32x128xbf16>
    %cst_25 = arith.constant 0.000000e+00 : bf16
    %31 = vector.broadcast %cst_25 : bf16 to vector<2x1x128xbf16>
    %c0_26 = arith.constant 0 : index
    %c0_27 = arith.constant 0 : index
    %c0_28 = arith.constant 0 : index
    %32 = vector.load %arg6[%c0_26, %c0_27, %c0_28] : memref<2x18x128xbf16, #tpu.memory_space<vmem>>, vector<2x1x128xbf16>
    tpu.vector_store %arg6[%c0_26, %c0_27, %c0_28], %31 {strides = array<i32>} : memref<2x18x128xbf16, #tpu.memory_space<vmem>>, vector<2x1x128xbf16>,
    %cst_29 = arith.constant 0.000000e+00 : bf16
    %33 = vector.broadcast %cst_29 : bf16 to vector<2x1x128xbf16>
    %c0_30 = arith.constant 0 : index
    %c17 = arith.constant 17 : index
    %c0_31 = arith.constant 0 : index
    %34 = vector.load %arg6[%c0_30, %c17, %c0_31] : memref<2x18x128xbf16, #tpu.memory_space<vmem>>, vector<2x1x128xbf16>
    tpu.vector_store %arg6[%c0_30, %c17, %c0_31], %33 {strides = array<i32>} : memref<2x18x128xbf16, #tpu.memory_space<vmem>>, vector<2x1x128xbf16>,
    %35 = vector.shape_cast %30 : vector<32x128xbf16> to vector<2x16x128xbf16>
    %c0_32 = arith.constant 0 : index
    %c1_33 = arith.constant 1 : index
    %c0_34 = arith.constant 0 : index
    %36 = vector.load %arg6[%c0_32, %c1_33, %c0_34] : memref<2x18x128xbf16, #tpu.memory_space<vmem>>, vector<2x16x128xbf16>
    tpu.vector_store %arg6[%c0_32, %c1_33, %c0_34], %35 {strides = array<i32>} : memref<2x18x128xbf16, #tpu.memory_space<vmem>>, vector<2x16x128xbf16>,
    %c0_35 = arith.constant 0 : index
    %c0_36 = arith.constant 0 : index
    %c0_37 = arith.constant 0 : index
    %37 = vector.load %arg6[%c0_35, %c0_36, %c0_37] : memref<2x18x128xbf16, #tpu.memory_space<vmem>>, vector<2x16x128xbf16>
    %38 = vector.shape_cast %37 : vector<2x16x128xbf16> to vector<32x128xbf16>
    %c0_38 = arith.constant 0 : index
    %c0_39 = arith.constant 0 : index
    %c0_40 = arith.constant 0 : index
    %39 = vector.load %arg3[%c0_38, %c0_39, %c0_40] : memref<3x128x128xbf16, #tpu.memory_space<vmem>>, vector<1x128x128xbf16>
    %40 = vector.shape_cast %39 : vector<1x128x128xbf16> to vector<128x128xbf16>
    %cst_41 = arith.constant dense<0.000000e+00> : vector<32x128xf32>
    %41 = tpu.matmul %38, %40, %cst_41 {dimension_numbers = #tpu.dot_dimension_numbers<[1], [0], [0], [1], [0, 0, 1, 1], [], []>} : vector<32x128xbf16>, vector<128x128xbf16>, vector<32x128xf32> -> vector<32x128xf32>
    %c1_42 = arith.constant 1 : index
    %c0_43 = arith.constant 0 : index
    %c0_44 = arith.constant 0 : index
    %42 = vector.load %arg3[%c1_42, %c0_43, %c0_44] : memref<3x128x128xbf16, #tpu.memory_space<vmem>>, vector<1x128x128xbf16>
    %43 = vector.shape_cast %42 : vector<1x128x128xbf16> to vector<128x128xbf16>
    %cst_45 = arith.constant dense<0.000000e+00> : vector<32x128xf32>
    %44 = tpu.matmul %30, %43, %cst_45 {dimension_numbers = #tpu.dot_dimension_numbers<[1], [0], [0], [1], [0, 0, 1, 1], [], []>} : vector<32x128xbf16>, vector<128x128xbf16>, vector<32x128xf32> -> vector<32x128xf32>
    %45 = arith.addf %41, %44 : vector<32x128xf32>
    %c0_46 = arith.constant 0 : index
    %c2_47 = arith.constant 2 : index
    %c0_48 = arith.constant 0 : index
    %46 = vector.load %arg6[%c0_46, %c2_47, %c0_48] : memref<2x18x128xbf16, #tpu.memory_space<vmem>>, vector<2x16x128xbf16>
    %47 = vector.shape_cast %46 : vector<2x16x128xbf16> to vector<32x128xbf16>
    %c2_49 = arith.constant 2 : index
    %c0_50 = arith.constant 0 : index
    %c0_51 = arith.constant 0 : index
    %48 = vector.load %arg3[%c2_49, %c0_50, %c0_51] : memref<3x128x128xbf16, #tpu.memory_space<vmem>>, vector<1x128x128xbf16>
    %49 = vector.shape_cast %48 : vector<1x128x128xbf16> to vector<128x128xbf16>
    %cst_52 = arith.constant dense<0.000000e+00> : vector<32x128xf32>
    %50 = tpu.matmul %47, %49, %cst_52 {dimension_numbers = #tpu.dot_dimension_numbers<[1], [0], [0], [1], [0, 0, 1, 1], [], []>} : vector<32x128xbf16>, vector<128x128xbf16>, vector<32x128xf32> -> vector<32x128xf32>
    %51 = arith.addf %45, %50 : vector<32x128xf32>
    %52 = vector.broadcast %2 : vector<1x128xf32> to vector<32x128xf32>
    %53 = arith.mulf %51, %52 : vector<32x128xf32>
    %54 = vector.broadcast %3 : vector<1x128xf32> to vector<32x128xf32>
    %55 = arith.addf %53, %54 : vector<32x128xf32>
    %56 = vector.shape_cast %4 : vector<2x16x128xf32> to vector<32x128xf32>
    %57 = arith.addf %55, %56 : vector<32x128xf32>
    %cst_53 = arith.constant 0.000000e+00 : f32
    %58 = vector.broadcast %cst_53 : f32 to vector<32x128xf32>
    %59 = arith.maximumf %57, %58 : vector<32x128xf32>
    %60 = vector.shape_cast %59 : vector<32x128xf32> to vector<2x16x128xf32>
    %c0_54 = arith.constant 0 : index
    %c0_55 = arith.constant 0 : index
    %c0_56 = arith.constant 0 : index
    %61 = vector.load %arg5[%c0_54, %c0_55, %c0_56] : memref<2x16x128xf32, #tpu.memory_space<vmem>>, vector<2x16x128xf32>
    tpu.vector_store %arg5[%c0_54, %c0_55, %c0_56], %60 {strides = array<i32>} : memref<2x16x128xf32, #tpu.memory_space<vmem>>, vector<2x16x128xf32>,
    return
  }
  func.func @transform_0(%arg0: i32) -> (i32, i32, i32) {
    %c0_i32 = arith.constant 0 : i32
    %c0_i32_0 = arith.constant 0 : i32
    %c0_i32_1 = arith.constant 0 : i32
    return %arg0, %c0_i32, %c0_i32_0 : i32, i32, i32
  }
  func.func @transform_1(%arg0: i32) -> (i32, i32, i32) {
    %c0_i32 = arith.constant 0 : i32
    %c0_i32_0 = arith.constant 0 : i32
    %c0_i32_1 = arith.constant 0 : i32
    %c0_i32_2 = arith.constant 0 : i32
    return %c0_i32, %c0_i32_0, %c0_i32_1 : i32, i32, i32
  }
  func.func @transform_2(%arg0: i32) -> (i32, i32, i32) {
    %c0_i32 = arith.constant 0 : i32
    %c0_i32_0 = arith.constant 0 : i32
    %c0_i32_1 = arith.constant 0 : i32
    %c0_i32_2 = arith.constant 0 : i32
    return %c0_i32, %c0_i32_0, %c0_i32_1 : i32, i32, i32
  }
  func.func @transform_3(%arg0: i32) -> (i32, i32) {
    %c0_i32 = arith.constant 0 : i32
    %c0_i32_0 = arith.constant 0 : i32
    %c0_i32_1 = arith.constant 0 : i32
    return %c0_i32, %c0_i32_0 : i32, i32
  }
  func.func @transform_4(%arg0: i32) -> (i32, i32, i32) {
    %c0_i32 = arith.constant 0 : i32
    %c0_i32_0 = arith.constant 0 : i32
    %c0_i32_1 = arith.constant 0 : i32
    return %arg0, %c0_i32, %c0_i32_0 : i32, i32, i32
  }
}

</mosaic_0001>

<bundles_post_ra>
// kernel: tile.23
= control target key start
LH: loop header
LB: loop body
LE: loop exit
PB: predicated region body
PF: predicated region fallthrough
CT: control target
= control target key end

     0   :  { %s28_s0 = inlined_call_operand.vmem [shape: f32[8], index: 0, kind: input, shape index: {}]   ;;  %s29_s1 = inlined_call_operand.vmem [shape: f32[16,8], index: 1, kind: output, shape index: {}]  }
   0x1   :  { %v4_v0 = vld [vmem:[%s28_s0] ss:$0 sm:$0xff] }
   0x2   :  { %5 = vst [vmem:[%s29_s1] sm:$0xff] %v4_v0  ;;  %8 = vst [vmem:[%s29_s1 + $0x8] sm:$0xff] %v4_v0 }

// kernel: tile.36
= control target key start
LH: loop header
LB: loop body
LE: loop exit
PB: predicated region body
PF: predicated region fallthrough
CT: control target
= control target key end

     0   :  { %s131_s10 = smov 120   ;;  %s132_s11 = smov 104   ;;  %vm3_vm0 = vcmask 64512   ;;  %vm9_vm1 = vcmask 1048512   ;;  %vm15_vm2 = vcmask 982912   ;;  %vm21_vm3 = vcmask 917312   ;;  %s207_s0 = inlined_call_operand.vmem [shape: f32[16,8], index: 0, kind: input, shape index: {}]   ;;  %s208_s1 = inlined_call_operand.vmem [shape: f32[1,128], index: 1, kind: output, shape index: {}]  }
   0x1   :  { %v101_v0 = vld [vmem:[%s207_s0 + $0xf] sm:$0x1]   ;;  %v103_v1 = vld [vmem:[%s207_s0 + $0xd] sm:$0x1]   ;;  %v102_v2 = vld [vmem:[%s207_s0 + $0xe] sm:$0x1]  }
   0x2   :  { %7 = vrot.lane.b32.xlu0 %v101_v0, %s131_s10  ;;  %19 = vrot.lane.b32.xlu1 %v103_v1, %s132_s11  ;;  %v104_v3 = vld [vmem:[%s207_s0 + $0xc] sm:$0x1]   ;;  %s133_s16 = smov 112   ;;  %s134_s17 = smov 96   ;;  %v105_v4 = vld [vmem:[%s207_s0 + $0xb] sm:$0x1]  }
   0x3   :  { %v106_v5 = vld [vmem:[%s207_s0 + $0xa] sm:$0x1]   ;;  %v2_v6 = vld [vmem:[%s207_s0] sm:$0x1]   ;;  %s135_s24 = smov 88   ;;  %s136_s25 = smov 80  }
   0x4   :  { %4 = vst.msk [vmem:[#allocation0] sm:$0x1] %vm3_vm0, %v2_v6   ;;  %v107_v7 = vld [vmem:[%s207_s0 + $0x9] sm:$0x1]   ;;  %v108_v8 = vld [vmem:[%s207_s0 + $0x8] sm:$0x1]  }
   0x5   :  { %s137_s30 = smov 72   ;;  %s138_s2 = smov 64   ;;  %v109_v9 = vld [vmem:[%s207_s0 + $0x7] sm:$0x1]   ;;  %v110_v10 = vld [vmem:[%s207_s0 + $0x6] sm:$0x1]  }
   0x6   :  { %13 = vrot.lane.b32.xlu0 %v102_v2, %s133_s16  ;;  %25 = vrot.lane.b32.xlu1 %v104_v3, %s134_s17  ;;  %s139_s7 = smov 56   ;;  %s140_s8 = smov 48   ;;  %v111_v11 = vld [vmem:[%s207_s0 + $0x5] sm:$0x1]   ;;  %v112_v12 = vld [vmem:[%s207_s0 + $0x4] sm:$0x1]  }
   0x7   :  { %s141_s13 = smov 40   ;;  %s142_s14 = smov 32   ;;  %v113_v13 = vld [vmem:[%s207_s0 + $0x3] sm:$0x1]   ;;  %v114_v14 = vld [vmem:[%s207_s0 + $0x2] sm:$0x1]  }
   0x8   :  { %s143_s19 = smov 24   ;;  %s144_s20 = smov 16   ;;  %v115_v15 = vld [vmem:[%s207_s0 + $0x1] sm:$0x1]   ;;  %vm27_vm4 = vcmask 851712   ;;  %vm33_vm5 = vcmask 786112  }
   0x9   :  { %s145_s0 = smov 8   ;;  %vm39_vm6 = vcmask 720512   ;;  %vm45_vm7 = vcmask 654912   ;;  %vm51_vm8 = vcmask 589312   ;;  %vm57_vm9 = vcmask 523712  }
   0xa   :  { %31 = vrot.lane.b32.xlu0 %v105_v4, %s135_s24  ;;  %37 = vrot.lane.b32.xlu1 %v106_v5, %s136_s25  ;;  %vm63_vm10 = vcmask 458112   ;;  %vm69_vm11 = vcmask 392512   ;;  %vm75_vm12 = vcmask 326912   ;;  %vm81_vm13 = vcmask 261312  }
   0xb   :  { %vm87_vm14 = vcmask 195712   ;;  %vm93_vm15 = vcmask 130112  }
   0xe   :  { %43 = vrot.lane.b32.xlu0 %v107_v7, %s137_s30  ;;  %49 = vrot.lane.b32.xlu1 %v108_v8, %s138_s2 }
  0x12   :  { %55 = vrot.lane.b32.xlu0 %v109_v9, %s139_s7  ;;  %61 = vrot.lane.b32.xlu1 %v110_v10, %s140_s8 }
  0x16   :  { %67 = vrot.lane.b32.xlu0 %v111_v11, %s141_s13  ;;  %73 = vrot.lane.b32.xlu1 %v112_v12, %s142_s14 }
  0x1a   :  { %79 = vrot.lane.b32.xlu0 %v113_v13, %s143_s19  ;;  %85 = vrot.lane.b32.xlu1 %v114_v14, %s144_s20 }
  0x1e   :  { %91 = vrot.lane.b32.xlu0 %v115_v15, %s145_s0 }
  0x74   :  { %v8_v16 = vpop.permute.xlu0 %7   ;;  %v20_v17 = vpop.permute.xlu1 %19  }
  0x75   :  { %10 = vst.msk [vmem:[#allocation0] sm:$0x1] %vm9_vm1, %v8_v16  }
  0x78   :  { %v14_v18 = vpop.permute.xlu0 %13   ;;  %v26_v19 = vpop.permute.xlu1 %25  }
  0x79   :  { %16 = vst.msk [vmem:[#allocation0] sm:$0x1] %vm15_vm2, %v14_v18  }
  0x7a   :  { %22 = vst.msk [vmem:[#allocation0] sm:$0x1] %vm21_vm3, %v20_v17  }
  0x7b   :  { %28 = vst.msk [vmem:[#allocation0] sm:$0x1] %vm27_vm4, %v26_v19  }
  0x7c   :  { %v32_v20 = vpop.permute.xlu0 %31   ;;  %v38_v21 = vpop.permute.xlu1 %37  }
  0x7d   :  { %34 = vst.msk [vmem:[#allocation0] sm:$0x1] %vm33_vm5, %v32_v20  }
  0x7e   :  { %40 = vst.msk [vmem:[#allocation0] sm:$0x1] %vm39_vm6, %v38_v21  }
  0x80   :  { %v44_v22 = vpop.permute.xlu0 %43   ;;  %v50_v23 = vpop.permute.xlu1 %49  }
  0x81   :  { %46 = vst.msk [vmem:[#allocation0] sm:$0x1] %vm45_vm7, %v44_v22  }
  0x82   :  { %52 = vst.msk [vmem:[#allocation0] sm:$0x1] %vm51_vm8, %v50_v23  }
  0x84   :  { %v56_v24 = vpop.permute.xlu0 %55   ;;  %v62_v25 = vpop.permute.xlu1 %61  }
  0x85   :  { %58 = vst.msk [vmem:[#allocation0] sm:$0x1] %vm57_vm9, %v56_v24  }
  0x86   :  { %64 = vst.msk [vmem:[#allocation0] sm:$0x1] %vm63_vm10, %v62_v25  }
  0x88   :  { %v68_v26 = vpop.permute.xlu0 %67   ;;  %v74_v27 = vpop.permute.xlu1 %73  }
  0x89   :  { %70 = vst.msk [vmem:[#allocation0] sm:$0x1] %vm69_vm11, %v68_v26  }
  0x8a   :  { %76 = vst.msk [vmem:[#allocation0] sm:$0x1] %vm75_vm12, %v74_v27  }
  0x8c   :  { %v80_v28 = vpop.permute.xlu0 %79   ;;  %v86_v29 = vpop.permute.xlu1 %85  }
  0x8d   :  { %82 = vst.msk [vmem:[#allocation0] sm:$0x1] %vm81_vm13, %v80_v28  }
  0x8e   :  { %88 = vst.msk [vmem:[#allocation0] sm:$0x1] %vm87_vm14, %v86_v29  }
  0x90   :  { %v92_v30 = vpop.permute.xlu0 %91  }
  0x91   :  { %94 = vst.msk [vmem:[#allocation0] sm:$0x1] %vm93_vm15, %v92_v30  }
  0x98   :  { %v98_v31 = vld [vmem:[#allocation0] sm:$0x1] }
  0x99   :  { %100 = vst [vmem:[%s208_s1] sm:$0x1] %v98_v31 }

// kernel: residual_block_2sl.1
= control target key start
LH: loop header
LB: loop body
LE: loop exit
PB: predicated region body
PF: predicated region fallthrough
CT: control target
= control target key end

     0   :  { %vm407_vm0 = vcmask 1040384   ;;  %vm408_vm1 = vsmask.f32 256  ;;  %v413_v50 = vld [vmem:[#allocation2 + $0xc] sm:$0x1]  ;;  %vm476_vm5 = vcmask 1043456   ;;  %s1587_s1 = inlined_call_operand.vmem [shape: bf16[3,128,128], index: 1, kind: input, shape index: {}]   ;;  %s1588_s0 = inlined_call_operand.vmem [shape: f32[2,18,128], index: 0, kind: input, shape index: {}]   ;;  %s1589_s2 = inlined_call_operand.vmem [shape: bf16[3,128,128], index: 2, kind: input, shape index: {}]   ;;  %s1590_s3 = inlined_call_operand.vmem [shape: f32[4,128], index: 3, kind: input, shape index: {}]   ;;  %s1591_s4 = inlined_call_operand.vmem [shape: f32[2,16,128], index: 4, kind: output, shape index: {}]  }
   0x1   :  { %v1248_v0 = vld [vmem:[%s1587_s1 + $0x40] sm:$0xff]   ;;  %v1249_v1 = vld [vmem:[%s1587_s1 + $0x48] sm:$0xff]   ;;  %v1250_v2 = vld [vmem:[%s1587_s1 + $0x50] sm:$0xff]   ;;  %vm416_vm3 = vsmask.f32 7938  ;;  %vm747_vm9 = vcmask 1042432  }
   0x2   :  { %1112 = vmatprep.subr.bf16.mxu0 %v1248_v0  ;;  %v1251_v3 = vld [vmem:[%s1587_s1 + $0x58] sm:$0xff]   ;;  %v1338_v4 = vld [vmem:[%s1588_s0 + $0x1] sm:$0xff]  ;;  %v1343_v5 = vld [vmem:[%s1588_s0 + $0x9] sm:$0xff]  ;;  %vm434_vm6 = vsmask.f32 4368  ;;  %vm748_vm10 = vcmask 1046532  }
   0x3   :  { %1113 = vmatpush3.bf16.msra.mxu0 %v1248_v0  ;;  %v48_v6 = vpack.c.bf16 %v1343_v5, %v1338_v4  ;;  %v1252_v7 = vld [vmem:[%s1587_s1 + $0x60] sm:$0xff]   ;;  %v1253_v8 = vld [vmem:[%s1587_s1 + $0x68] sm:$0xff]   ;;  %v1254_v9 = vld [vmem:[%s1587_s1 + $0x70] sm:$0xff]  }
   0x4   :  { %1114 = vmatprep.subr.bf16.mxu0 %v1249_v1  ;;  %v1255_v10 = vld [vmem:[%s1587_s1 + $0x78] sm:$0xff]   ;;  %v1256_v11 = vld [vmem:[%s1587_s1] sm:$0xff]   ;;  %v27_v15 = vld [vmem:[%s1588_s0 + $0x8] sm:$0xff] }
   0x5   :  { %1128 = vmatprep.mubr.bf16.mxu0 %v48_v6  ;;  %v1365_v12 = vld [vmem:[%s1588_s0 + $0x19] sm:$0xff]  ;;  %v1370_v13 = vld [vmem:[%s1588_s0 + $0x21] sm:$0xff]  ;;  %v1274_v21 = vld [vmem:[%s1589_s2 + $0x50] sm:$0xff]  }
   0x6   :  { %v26_v14 = vld [vmem:[%s1588_s0] sm:$0xff]  ;;  %v1273_v17 = vld [vmem:[%s1589_s2 + $0x48] sm:$0xff]   ;;  %v49_v18 = vpack.c.bf16 %v1370_v13, %v1365_v12  ;;  %v1258_v22 = vld [vmem:[%s1587_s1 + $0x10] sm:$0xff]  }
   0x7   :  { %1115 = vmatpush3.bf16.msra.mxu0 %v1249_v1  ;;  %v1272_v16 = vld [vmem:[%s1589_s2 + $0x40] sm:$0xff]   ;;  %v30_v19 = vpack.c.bf16 %v27_v15, %v26_v14  ;;  %v1257_v20 = vld [vmem:[%s1587_s1 + $0x8] sm:$0xff]   ;;  %v1275_v23 = vld [vmem:[%s1589_s2 + $0x58] sm:$0xff]  }
   0x8   :  { %1116 = vmatprep.subr.bf16.mxu0 %v1250_v2  ;;  %1172 = vmatprep.subr.bf16.mxu1 %v1272_v16  ;;  %v1259_v24 = vld [vmem:[%s1587_s1 + $0x18] sm:$0xff]   ;;  %v1276_v25 = vld [vmem:[%s1589_s2 + $0x60] sm:$0xff]   ;;  %v1261_v27 = vld [vmem:[%s1587_s1 + $0x28] sm:$0xff]  }
   0x9   :  { %1173 = vmatpush3.bf16.msra.mxu1 %v1272_v16  ;;  %v1260_v26 = vld [vmem:[%s1587_s1 + $0x20] sm:$0xff]   ;;  %v1262_v28 = vld [vmem:[%s1587_s1 + $0x30] sm:$0xff]   ;;  %v1263_v29 = vld [vmem:[%s1587_s1 + $0x38] sm:$0xff]  }
   0xa   :  { %1174 = vmatprep.subr.bf16.mxu1 %v1273_v17  ;;  %v28_v30 = vld [vmem:[%s1588_s0 + $0x18] sm:$0xff]  ;;  %v29_v31 = vld [vmem:[%s1588_s0 + $0x20] sm:$0xff]  ;;  %v262_v34 = vld [vmem:[%s1588_s0 + $0xa] sm:$0xff] }
   0xb   :  { %1117 = vmatpush3.bf16.msra.mxu0 %v1250_v2  ;;  %v1264_v32 = vld [vmem:[%s1587_s1 + $0x80] sm:$0xff]   ;;  %v31_v35 = vpack.c.bf16 %v29_v31, %v28_v30  ;;  %v1265_v37 = vld [vmem:[%s1587_s1 + $0x88] sm:$0xff]   ;;  %v1266_v38 = vld [vmem:[%s1587_s1 + $0x90] sm:$0xff]  }
   0xc   :  { %1118 = vmatprep.subr.bf16.mxu0 %v1251_v3  ;;  %v261_v33 = vld [vmem:[%s1588_s0 + $0x2] sm:$0xff]  ;;  %v1267_v39 = vld [vmem:[%s1587_s1 + $0x98] sm:$0xff]   ;;  %v1270_v42 = vld [vmem:[%s1587_s1 + $0xb0] sm:$0xff]  }
   0xd   :  { %1175 = vmatpush3.bf16.msra.mxu1 %v1273_v17  ;;  %v265_v36 = vpack.c.bf16 %v262_v34, %v261_v33  ;;  %v1268_v40 = vld [vmem:[%s1587_s1 + $0xa0] sm:$0xff]   ;;  %v1269_v41 = vld [vmem:[%s1587_s1 + $0xa8] sm:$0xff]   ;;  %v1271_v43 = vld [vmem:[%s1587_s1 + $0xb8] sm:$0xff]  }
   0xe   :  { %1176 = vmatprep.subr.bf16.mxu1 %v1274_v21  ;;  %v263_v44 = vld [vmem:[%s1588_s0 + $0x1a] sm:$0xff]  ;;  %v264_v45 = vld [vmem:[%s1588_s0 + $0x22] sm:$0xff]  ;;  %v1278_v48 = vld [vmem:[%s1589_s2 + $0x70] sm:$0xff]  }
   0xf   :  { %1119 = vmatpush3.bf16.msra.mxu0 %v1251_v3  ;;  %v266_v46 = vpack.c.bf16 %v264_v45, %v263_v44  ;;  %v1277_v47 = vld [vmem:[%s1589_s2 + $0x68] sm:$0xff]   ;;  %vm1465_vm2 = vmand %vm407_vm0, %vm408_vm1  ;;  %v421_v53 = vld [vmem:[#allocation2 + $0x14] sm:$0x1] }
  0x10   :  { %1120 = vmatprep.subr.bf16.mxu0 %v1252_v7  ;;  %v418_v51 = vld [vmem:[#allocation2 + $0x8] sm:$0x1]  ;;  %v414_v52 = vsel %vm1465_vm2, 0, %v413_v50  ;;  %vm417_vm4 = vmand %vm407_vm0, %vm416_vm3  ;;  %v1279_v54 = vld [vmem:[%s1589_s2 + $0x78] sm:$0xff]  }
  0x11   :  { %1177 = vmatpush3.bf16.msra.mxu1 %v1274_v21  ;;  %415 = vst [vmem:[#allocation2 + $0xc] sm:$0x1] %v414_v52  ;;  %v419_v55 = vsel %vm417_vm4, 0, %v418_v51  ;;  %v422_v56 = vsel %vm417_vm4, 0, %v421_v53  ;;  %v410_v57 = vld [vmem:[#allocation2] sm:$0x1]  ;;  %vm1490_vm7 = vmand %vm476_vm5, %vm416_vm3 }
  0x12   :  { %1178 = vmatprep.subr.bf16.mxu1 %v1275_v23  ;;  %420 = vst [vmem:[#allocation2 + $0x8] sm:$0x1] %v419_v55  ;;  %423 = vst [vmem:[#allocation2 + $0x14] sm:$0x1] %v422_v56  ;;  %v411_v58 = vsel %vm1465_vm2, 0, %v410_v57  ;;  %v1280_v59 = vld [vmem:[%s1589_s2] sm:$0xff]  }
  0x13   :  { %1121 = vmatpush3.bf16.msra.mxu0 %v1252_v7  ;;  %412 = vst [vmem:[#allocation2] sm:$0x1] %v411_v58  ;;  %v978_v60 = vld [vmem:[%s1590_s3] ss:$0 sm:$0xff]  ;;  %v979_v61 = vld [vmem:[%s1590_s3 + $0x1] ss:$0 sm:$0xff]  ;;  %vm1495_vm8 = vmor %vm408_vm1, %vm434_vm6 }
  0x14   :  { %1122 = vmatprep.subr.bf16.mxu0 %v1253_v8  ;;  %v1282_v50 = vld [vmem:[%s1589_s2 + $0x10] sm:$0xff]   ;;  %v1286_v49 = vld [vmem:[%s1589_s2 + $0x28] sm:$0xff]   ;;  %vm1532_vm11 = vmor %vm747_vm9, %vm748_vm10 }
  0x15   :  { %1179 = vmatpush3.bf16.msra.mxu1 %v1275_v23 }
  0x16   :  { %1180 = vmatprep.subr.bf16.mxu1 %v1276_v25 }
  0x17   :  { %1123 = vmatpush3.bf16.msra.mxu0 %v1253_v8 }
  0x18   :  { %1124 = vmatprep.subr.bf16.mxu0 %v1254_v9  ;;  %v485_v31 = vld [vmem:[#allocation2 + $0xc] sm:$0xf] }
  0x19   :  { %1181 = vmatpush3.bf16.msra.mxu1 %v1276_v25 }
  0x1a   :  { %1182 = vmatprep.subr.bf16.mxu1 %v1277_v47 }
  0x1b   :  { %1125 = vmatpush3.bf16.msra.mxu0 %v1254_v9 }
  0x1c   :  { %1126 = vmatprep.subr.bf16.mxu0 %v1255_v10 }
  0x1d   :  { %1183 = vmatpush3.bf16.msra.mxu1 %v1277_v47 }
  0x1e   :  { %1184 = vmatprep.subr.bf16.mxu1 %v1278_v48 }
  0x1f   :  { %1127 = vmatpush3.bf16.msra.mxu0 %v1255_v10 }
  0x20   :  { %1132 = vmatprep.subr.bf16.mxu0 %v1256_v11 }
  0x21   :  { %1185 = vmatpush3.bf16.msra.mxu1 %v1278_v48  ;;  %v482_v48 = vld [vmem:[#allocation2 + $0x8] sm:$0x1] }
  0x22   :  { %1129 = vmatmul.mubr.bf16.vlgmr.msra.gmra.mrb[0].mxu0 %v49_v18  ;;  %1186 = vmatprep.subr.bf16.mxu1 %v1279_v54 }
  0x23   :  { %1133 = vmatpush3.bf16.msra.mxu0 %v1256_v11  ;;  %1148 = vmatprep.mubr.bf16.mxu0 %v30_v19 }
  0x24   :  { %1134 = vmatprep.subr.bf16.mxu0 %v1257_v20 }
  0x25   :  { %1187 = vmatpush3.bf16.msra.mxu1 %v1279_v54 }
  0x26   :  { %1192 = vmatprep.subr.bf16.mxu1 %v1280_v59 }
  0x27   :  { %1135 = vmatpush3.bf16.msra.mxu0 %v1257_v20 }
  0x28   :  { %1136 = vmatprep.subr.bf16.mxu0 %v1258_v22 }
  0x2b   :  { %1137 = vmatpush3.bf16.msra.mxu0 %v1258_v22 }
  0x2c   :  { %1138 = vmatprep.subr.bf16.mxu0 %v1259_v24 }
  0x2f   :  { %1139 = vmatpush3.bf16.msra.mxu0 %v1259_v24 }
  0x30   :  { %1140 = vmatprep.subr.bf16.mxu0 %v1260_v26 }
  0x33   :  { %1141 = vmatpush3.bf16.msra.mxu0 %v1260_v26 }
  0x34   :  { %1142 = vmatprep.subr.bf16.mxu0 %v1261_v27 }
  0x37   :  { %1143 = vmatpush3.bf16.msra.mxu0 %v1261_v27 }
  0x38   :  { %1144 = vmatprep.subr.bf16.mxu0 %v1262_v28 }
  0x3b   :  { %1145 = vmatpush3.bf16.msra.mxu0 %v1262_v28 }
  0x3c   :  { %1146 = vmatprep.subr.bf16.mxu0 %v1263_v29 }
  0x3f   :  { %1147 = vmatpush3.bf16.msra.mxu0 %v1263_v29  ;;  %v1281_v29 = vld [vmem:[%s1589_s2 + $0x8] sm:$0xff]  }
  0x40   :  { %1152 = vmatprep.subr.bf16.mxu0 %v1264_v32 }
  0x42   :  { %1149 = vmatmul.mubr.bf16.vlgmr.msra.gmra.mrb[0].mxu0 %v31_v35 }
  0x43   :  { %1153 = vmatpush3.bf16.msra.mxu0 %v1264_v32  ;;  %1168 = vmatprep.mubr.bf16.mxu0 %v265_v36 }
  0x44   :  { %1154 = vmatprep.subr.bf16.mxu0 %v1265_v37 }
  0x47   :  { %1155 = vmatpush3.bf16.msra.mxu0 %v1265_v37 }
  0x48   :  { %1156 = vmatprep.subr.bf16.mxu0 %v1266_v38 }
  0x4b   :  { %1157 = vmatpush3.bf16.msra.mxu0 %v1266_v38  ;;  %v478_v38 = vld [vmem:[#allocation2] sm:$0xf] }
  0x4c   :  { %1158 = vmatprep.subr.bf16.mxu0 %v1267_v39 }
  0x4f   :  { %1159 = vmatpush3.bf16.msra.mxu0 %v1267_v39 }
  0x50   :  { %1160 = vmatprep.subr.bf16.mxu0 %v1268_v40 }
  0x53   :  { %1161 = vmatpush3.bf16.msra.mxu0 %v1268_v40  ;;  %v489_v40 = vld [vmem:[#allocation2 + $0x14] sm:$0x1] }
  0x54   :  { %1162 = vmatprep.subr.bf16.mxu0 %v1269_v41 }
  0x57   :  { %1163 = vmatpush3.bf16.msra.mxu0 %v1269_v41 }
  0x58   :  { %1164 = vmatprep.subr.bf16.mxu0 %v1270_v42 }
  0x5b   :  { %1165 = vmatpush3.bf16.msra.mxu0 %v1270_v42 }
  0x5c   :  { %1166 = vmatprep.subr.bf16.mxu0 %v1271_v43 }
  0x5f   :  { %1167 = vmatpush3.bf16.msra.mxu0 %v1271_v43 }
  0x62   :  { %1169 = vmatmul.mubr.bf16.vlgmr.msra.gmra.mrb[0].mxu0 %v266_v46 }
 0x135   :  { %v1170_v62 = vpop.f32.mrb[0].mxu0 }
 0x136   :  { %v391_v63 = vmul.f32 %v1170_v62, %v978_v60  ;;  %v366_v0 = vpop.f32.mrb[1].mxu0 }
 0x137   :  { %v389_v1 = vmul.f32 %v978_v60, %v366_v0  ;;  %v1171_v2 = vpop.f32.mrb[2].mxu0 }
 0x138   :  { %v399_v3 = vadd.f32 %v979_v61, %v391_v63  ;;  %v392_v6 = vmul.f32 %v1171_v2, %v978_v60  ;;  %v369_v7 = vpop.f32.mrb[3].mxu0  ;;  %v1287_v63 = vld [vmem:[%s1589_s2 + $0x30] sm:$0xff]  }
 0x139   :  { %v390_v8 = vmul.f32 %v978_v60, %v369_v7  ;;  %v397_v9 = vadd.f32 %v979_v61, %v389_v1  ;;  %v1284_v60 = vld [vmem:[%s1589_s2 + $0x20] sm:$0xff]   ;;  %v1288_v1 = vld [vmem:[%s1589_s2 + $0x38] sm:$0xff]  }
 0x13a   :  { %v403_v10 = vmax.f32 %v399_v3, 0.0  ;;  %v400_v11 = vadd.f32 %v979_v61, %v392_v6  ;;  %v1290_v7 = vld [vmem:[%s1589_s2 + $0x80] sm:$0xff]  }
 0x13b   :  { %v398_v14 = vadd.f32 %v979_v61, %v390_v8  ;;  %v401_v15 = vmax.f32 %v397_v9, 0.0 }
 0x13c   :  { %v1050_v16 = vpack.c.bf16 %v403_v10, %v403_v10  ;;  %v404_v17 = vmax.f32 %v400_v11, 0.0 }
 0x13d   :  { %v402_v18 = vmax.f32 %v398_v14, 0.0  ;;  %v1048_v19 = vpack.c.bf16 %v401_v15, %v401_v15 }
 0x13e   :  { %v454_v20 = vshrl.u32 %v1050_v16, 16  ;;  %v1051_v21 = vpack.c.bf16 %v404_v17, %v404_v17  ;;  %v406_v22 = vpack.c.bf16 %v404_v17, %v403_v10  ;;  %v457_v27 = vshll.u32 %v1050_v16, 16  ;;  %v1291_v16 = vld [vmem:[%s1589_s2 + $0x88] sm:$0xff]  }
 0x13f   :  { %v405_v23 = vpack.c.bf16 %v402_v18, %v401_v15  ;;  %v1049_v24 = vpack.c.bf16 %v402_v18, %v402_v18  ;;  %v437_v25 = vshrl.u32 %v1048_v19, 16  ;;  %v440_v33 = vshll.u32 %v1048_v19, 16  ;;  %v1292_v18 = vld [vmem:[%s1589_s2 + $0x90] sm:$0xff]   ;;  %v1293_v19 = vld [vmem:[%s1589_s2 + $0x98] sm:$0xff]  }
 0x140   :  { %v456_v26 = vrot.slane %v454_v20, 7  ;;  %v462_v28 = vshrl.u32 %v1051_v21, 16  ;;  %v465_v37 = vshll.u32 %v1051_v21, 16  ;;  %v1294_v20 = vld [vmem:[%s1589_s2 + $0xa0] sm:$0xff]   ;;  %v1295_v21 = vld [vmem:[%s1589_s2 + $0xa8] sm:$0xff]  }
 0x141   :  { %v439_v32 = vrot.slane %v437_v25, 7  ;;  %v445_v34 = vshrl.u32 %v1049_v24, 16  ;;  %1188 = vmatprep.mubr.bf16.mxu1 %v405_v23  ;;  %v448_v43 = vshll.u32 %v1049_v24, 16  ;;  %v1296_v23 = vld [vmem:[%s1589_s2 + $0xb0] sm:$0xff]   ;;  %v1297_v25 = vld [vmem:[%s1589_s2 + $0xb8] sm:$0xff]  }
 0x142   :  { %v459_v35 = vor.u32 %v457_v27, %v456_v26  ;;  %v464_v36 = vrot.slane %v462_v28, 7  ;;  %1189 = vmatmul.mubr.bf16.vlgmr.msra.gmra.mrb[0].mxu1 %v406_v22  ;;  %v460_v44 = vrot.slane %v456_v26, 4 }
 0x143   :  { %v442_v41 = vor.u32 %v440_v33, %v439_v32  ;;  %v447_v42 = vrot.slane %v445_v34, 7  ;;  %1193 = vmatpush3.bf16.msra.mxu1 %v1280_v59  ;;  %v443_v51 = vrot.slane %v439_v32, 4  ;;  %v1283_v59 = vld [vmem:[%s1589_s2 + $0x18] sm:$0xff]   ;;  %v1046_v34 = vld [vmem:[%s1590_s3 + $0x2] ss:$0 sm:$0xff] }
 0x144   :  { %v486_v45 = vsel %vm1490_vm7, %v459_v35, %v485_v31  ;;  %v467_v46 = vor.u32 %v465_v37, %v464_v36  ;;  %v469_v47 = vrot.slane %v464_v36, 4  ;;  %1194 = vmatprep.subr.bf16.mxu1 %v1281_v29  ;;  %v1047_v35 = vld [vmem:[%s1590_s3 + $0x3] ss:$0 sm:$0xff] }
 0x145   :  { %487 = vst [vmem:[#allocation2 + $0xc] sm:$0xf] %v486_v45  ;;  %v450_v52 = vor.u32 %v448_v43, %v447_v42  ;;  %v452_v53 = vrot.slane %v447_v42, 4  ;;  %v479_v54 = vsel %vm1490_vm7, %v442_v41, %v478_v38 }
 0x146   :  { %v468_v55 = vsel %vm1495_vm8, %v460_v44, %v467_v46  ;;  %v490_v56 = vsel %vm1465_vm2, %v469_v47, %v489_v40  ;;  %480 = vst [vmem:[#allocation2] sm:$0xf] %v479_v54 }
 0x147   :  { %488 = vst [vmem:[#allocation2 + $0x10] sm:$0xf] %v468_v55  ;;  %491 = vst [vmem:[#allocation2 + $0x14] sm:$0x1] %v490_v56  ;;  %v451_v57 = vsel %vm1495_vm8, %v443_v51, %v450_v52  ;;  %v483_v58 = vsel %vm1465_vm2, %v452_v53, %v482_v48  ;;  %1195 = vmatpush3.bf16.msra.mxu1 %v1281_v29 }
 0x148   :  { %481 = vst [vmem:[#allocation2 + $0x4] sm:$0xf] %v451_v57  ;;  %484 = vst [vmem:[#allocation2 + $0x8] sm:$0x1] %v483_v58  ;;  %1196 = vmatprep.subr.bf16.mxu1 %v1282_v50 }
 0x14b   :  { %1197 = vmatpush3.bf16.msra.mxu1 %v1282_v50 }
 0x14c   :  { %1198 = vmatprep.subr.bf16.mxu1 %v1283_v59  ;;  %v738_v28 = vld [vmem:[#allocation2 + $0xc] sm:$0xe] }
 0x14d   :  { %v735_v6 = vld [vmem:[#allocation2] sm:$0xe]  ;;  %v1019_v30 = vrot.slane %v738_v28, 9 }
 0x14e   :  { %v1018_v10 = vrot.slane %v735_v6, 9  ;;  %v1289_v14 = vld [vmem:[#allocation2 + $0xc] sm:$0xff]   ;;  %v740_v26 = vld [vmem:[#allocation2 + $0x14] sm:$0x1] }
 0x14f   :  { %1199 = vmatpush3.bf16.msra.mxu1 %v1283_v59  ;;  %v1285_v61 = vld [vmem:[#allocation2] sm:$0xff]   ;;  %v737_v2 = vld [vmem:[#allocation2 + $0x8] sm:$0x1]  ;;  %v739_v22 = vld [vmem:[#allocation2 + $0x10] sm:$0xf]  ;;  %v762_v29 = vrot.slane %v740_v26, 5 }
 0x150   :  { %1200 = vmatprep.subr.bf16.mxu1 %v1284_v60  ;;  %1208 = vmatprep.mubr.bf16.mxu1 %v1285_v61  ;;  %v736_v62 = vld [vmem:[#allocation2 + $0x4] sm:$0xf]  ;;  %v755_v8 = vrot.slane %v737_v2, 5  ;;  %v759_v24 = vrot.slane %v739_v22, 5 }
 0x151   :  { %v752_v0 = vrot.slane %v736_v62, 5 }
 0x152   :  { %v761_v27 = vrot.slane %v759_v24, 4  ;;  %v760_v32 = vsel %vm1532_vm11, %v1019_v30, %v759_v24 }
 0x153   :  { %1201 = vmatpush3.bf16.msra.mxu1 %v1284_v60  ;;  %v754_v3 = vrot.slane %v752_v0, 4  ;;  %v753_v15 = vsel %vm1532_vm11, %v1018_v10, %v752_v0 }
 0x154   :  { %1202 = vmatprep.subr.bf16.mxu1 %v1286_v49  ;;  %v763_v31 = vsel %vm1532_vm11, %v761_v27, %v762_v29 }
 0x155   :  { %v756_v11 = vsel %vm1532_vm11, %v754_v3, %v755_v8  ;;  %v1037_v33 = vcombine.low %v760_v32, %v763_v31 }
 0x156   :  { %v1036_v17 = vcombine.low %v753_v15, %v756_v11 }
 0x157   :  { %1203 = vmatpush3.bf16.msra.mxu1 %v1286_v49 }
 0x158   :  { %1204 = vmatprep.subr.bf16.mxu1 %v1287_v63 }
 0x15b   :  { %1205 = vmatpush3.bf16.msra.mxu1 %v1287_v63 }
 0x15c   :  { %1206 = vmatprep.subr.bf16.mxu1 %v1288_v1 }
 0x15f   :  { %1207 = vmatpush3.bf16.msra.mxu1 %v1288_v1 }
 0x160   :  { %1212 = vmatprep.subr.bf16.mxu1 %v1290_v7 }
 0x162   :  { %1209 = vmatmul.mubr.bf16.vlgmr.msra.gmra.mrb[0].mxu1 %v1289_v14 }
 0x163   :  { %1213 = vmatpush3.bf16.msra.mxu1 %v1290_v7  ;;  %1228 = vmatprep.mubr.bf16.mxu1 %v1036_v17 }
 0x164   :  { %1214 = vmatprep.subr.bf16.mxu1 %v1291_v16 }
 0x167   :  { %1215 = vmatpush3.bf16.msra.mxu1 %v1291_v16 }
 0x168   :  { %1216 = vmatprep.subr.bf16.mxu1 %v1292_v18 }
 0x16b   :  { %1217 = vmatpush3.bf16.msra.mxu1 %v1292_v18 }
 0x16c   :  { %1218 = vmatprep.subr.bf16.mxu1 %v1293_v19 }
 0x16f   :  { %1219 = vmatpush3.bf16.msra.mxu1 %v1293_v19 }
 0x170   :  { %1220 = vmatprep.subr.bf16.mxu1 %v1294_v20 }
 0x173   :  { %1221 = vmatpush3.bf16.msra.mxu1 %v1294_v20 }
 0x174   :  { %1222 = vmatprep.subr.bf16.mxu1 %v1295_v21 }
 0x177   :  { %1223 = vmatpush3.bf16.msra.mxu1 %v1295_v21 }
 0x178   :  { %1224 = vmatprep.subr.bf16.mxu1 %v1296_v23 }
 0x17b   :  { %1225 = vmatpush3.bf16.msra.mxu1 %v1296_v23 }
 0x17c   :  { %1226 = vmatprep.subr.bf16.mxu1 %v1297_v25 }
 0x17f   :  { %1227 = vmatpush3.bf16.msra.mxu1 %v1297_v25 }
 0x182   :  { %1229 = vmatmul.mubr.bf16.vlgmr.msra.gmra.mrb[0].mxu1 %v1037_v33 }
 0x255   :  { %v1230_v36 = vpop.f32.mrb[0].mxu1 }
 0x256   :  { %v896_v37 = vmul.f32 %v1230_v36, %v1046_v34  ;;  %v871_v38 = vpop.f32.mrb[1].mxu1 }
 0x257   :  { %v894_v39 = vmul.f32 %v1046_v34, %v871_v38  ;;  %v1231_v40 = vpop.f32.mrb[2].mxu1 }
 0x258   :  { %v904_v41 = vadd.f32 %v1047_v35, %v896_v37  ;;  %v897_v42 = vmul.f32 %v1231_v40, %v1046_v34  ;;  %v874_v43 = vpop.f32.mrb[3].mxu1 }
 0x259   :  { %v902_v44 = vadd.f32 %v1047_v35, %v894_v39  ;;  %v895_v45 = vmul.f32 %v1046_v34, %v874_v43 }
 0x25a   :  { %v908_v46 = vadd.f32 %v904_v41, %v1365_v12  ;;  %v905_v47 = vadd.f32 %v1047_v35, %v897_v42 }
 0x25b   :  { %v906_v48 = vadd.f32 %v902_v44, %v1338_v4  ;;  %v903_v50 = vadd.f32 %v1047_v35, %v895_v45 }
 0x25c   :  { %v912_v51 = vmax.f32 %v908_v46, 0.0  ;;  %v909_v52 = vadd.f32 %v905_v47, %v1370_v13 }
 0x25d   :  { %v910_v53 = vmax.f32 %v906_v48, 0.0  ;;  %v907_v54 = vadd.f32 %v903_v50, %v1343_v5 }
 0x25e   :  { %916 = vst [vmem:[%s1591_s4 + $0x10] sm:$0xff] %v912_v51  ;;  %v913_v55 = vmax.f32 %v909_v52, 0.0 }
 0x25f   :  { %914 = vst [vmem:[%s1591_s4] sm:$0xff] %v910_v53  ;;  %v911_v12 = vmax.f32 %v907_v54, 0.0 }
 0x260   :  { %917 = vst [vmem:[%s1591_s4 + $0x18] sm:$0xff] %v913_v55 }
 0x261   :  { %915 = vst [vmem:[%s1591_s4 + $0x8] sm:$0xff] %v911_v12 }

</bundles_post_ra>
